<compile_context>
chip_gen: v5e
topology: v5e:2x2
jax: 0.10.0
libtpu: 0.0.40
codegen_flags: <defaults>
</compile_context>

<pallas_src>
import functools

import numpy as np
import jax
import jax.numpy as jnp
from jax.experimental import pallas as pl
from jax.experimental.pallas import tpu as pltpu


def _round_up(v, m):
    return (v + m - 1) // m * m


# ----------------------------------------------------------------------------
# Probe: does this JAX build accept pipeline_mode=pl.Buffered(1) on a
# pallas_call input spec?  Used to single-buffer grid-invariant operands.
# ----------------------------------------------------------------------------
def _probe_single_buffering():
    try:
        def _copy(x_ref, o_ref):
            o_ref[...] = x_ref[...]

        fn = pl.pallas_call(
            _copy,
            out_shape=jax.ShapeDtypeStruct((8, 128), jnp.float32),
            grid_spec=pltpu.PrefetchScalarGridSpec(
                num_scalar_prefetch=0,
                grid=(2,),
                in_specs=[pl.BlockSpec((8, 128), lambda i: (0, 0),
                                       pipeline_mode=pl.Buffered(1))],
                out_specs=pl.BlockSpec((8, 128), lambda i: (0, 0)),
            ),
        )
        jax.block_until_ready(fn(jnp.zeros((8, 128), jnp.float32)))
        return True
    except Exception:
        return False


_SINGLE_BUFFER_OK = _probe_single_buffering()


def _column_masks(W, HW, dilation):
    """(2, HW) masks: row 0 valid for dx=-dilation, row 1 valid for dx=+dilation.

    Row/flat out-of-range taps are handled by the flat zero padding of the
    input; only the column (row-wrap) condition needs a mask."""
    cols = np.arange(HW, dtype=np.int64) % W
    left = (cols >= dilation).astype(np.float32)         # dx = -dilation valid
    right = (cols < W - dilation).astype(np.float32)     # dx = +dilation valid
    return np.stack([left, right], axis=0)                # (2, HW)


# ----------------------------------------------------------------------------
# Kernel A (small Cin): im2col scratch + single K=9*Cp MXU matmul per Cout tile.
#   x_ref    : (Cp, HW + 2*pad)  bf16   flat-zero-padded, channel-padded input
#   mask_ref : (2, HW)           bf16   left/right column masks
#   w_ref    : (TCO, 9*Cp)       bf16   BN-scale-folded conv weight tile
#   bias_ref : (TCO, 1)          f32    folded BN bias tile
#   o_ref    : (TCO, HW)                output (lane-dense last dim)
#   col_ref  : (9*Cp, HW)        bf16   im2col scratch (VMEM, built once per b)
# ----------------------------------------------------------------------------
def _convnorm_im2col_kernel(x_ref, mask_ref, w_ref, bias_ref, o_ref, col_ref,
                            *, img_w, dilation):
    cp, hwp = x_ref.shape
    hw = o_ref.shape[1]
    pad = (hwp - hw) // 2          # = dilation * (img_w + 1)

    @pl.when(pl.program_id(1) == 0)        # build im2col once per batch element
    def _build():
        left = mask_ref[0:1, :]            # (1, hw) bf16
        right = mask_ref[1:2, :]
        k = 0
        for dy in (-dilation, 0, dilation):
            for dx in (-dilation, 0, dilation):
                tap = x_ref[:, pl.ds(pad + dy * img_w + dx, hw)]   # (cp, hw) bf16
                if dx != 0:
                    tap = tap * (left if dx < 0 else right)
                col_ref[pl.ds(k * cp, cp), :] = tap                # 16-aligned rows
                k += 1

    # Single fused conv matmul: (TCO, 9*Cp) @ (9*Cp, HW), f32 accumulation.
    acc = jnp.dot(w_ref[...], col_ref[...], preferred_element_type=jnp.float32)
    # Folded-BN bias + ReLU epilogue (scale already folded into the weight).
    o_ref[...] = jnp.maximum(acc + bias_ref[...], 0.0).astype(o_ref.dtype)


# ----------------------------------------------------------------------------
# Kernel B (large Cin, Cp >= 128): scratch-free; 9 accumulating matmuls on
# shifted x slices, masking the (TCO, HW) partial per output lane.
# ----------------------------------------------------------------------------
def _convnorm_direct_kernel(x_ref, mask_ref, w_ref, bias_ref, o_ref,
                            *, img_w, dilation):
    cp, hwp = x_ref.shape
    hw = o_ref.shape[1]
    pad = (hwp - hw) // 2
    left = mask_ref[0:1, :].astype(jnp.float32)
    right = mask_ref[1:2, :].astype(jnp.float32)

    acc = None
    k = 0
    for dy in (-dilation, 0, dilation):
        for dx in (-dilation, 0, dilation):
            tap = x_ref[:, pl.ds(pad + dy * img_w + dx, hw)]       # (cp, hw) bf16
            part = jnp.dot(w_ref[:, pl.ds(k * cp, cp)], tap,
                           preferred_element_type=jnp.float32)     # (TCO, hw) f32
            if dx != 0:
                part = part * (left if dx < 0 else right)
            acc = part if acc is None else acc + part
            k += 1
    o_ref[...] = jnp.maximum(acc + bias_ref[...], 0.0).astype(o_ref.dtype)


# ----------------------------------------------------------------------------
# Wrapper: layout glue (reshape / zero-pad only), constant prep, pallas_call.
# ----------------------------------------------------------------------------
@functools.partial(jax.jit, static_argnames=("dilation", "eps"))
def conv_norm(x_nchw, weight, bn_gamma, bn_beta, bn_mean, bn_var,
              *, dilation=1, eps=1e-5):
    B, Cin, H, W = x_nchw.shape
    Cout = weight.shape[0]
    assert weight.shape == (Cout, Cin, 3, 3)

    HW = H * W
    Cp = _round_up(Cin, 16)                 # bf16 sublane-tile aligned channels
    pad = dilation * (W + 1)                # max |flat shift| of any tap

    # Cout tiling: one tile when small, 256-row (MXU-sized) tiles when large.
    tco = _round_up(Cout, 8) if Cout <= 256 else 256
    cout_p = _round_up(Cout, tco)
    n_co = cout_p // tco
    use_direct = Cp >= 128                  # scratch-free path for large Cin

    # ---- input: bf16, channel-pad + flat spatial zero-pad (no transposes) --
    x_flat = x_nchw.astype(jnp.bfloat16).reshape(B, Cin, HW)
    if Cp != Cin:
        x_flat = jnp.pad(x_flat, ((0, 0), (0, Cp - Cin), (0, 0)))
    x_padded = jnp.pad(x_flat, ((0, 0), (0, 0), (pad, pad)))      # (B,Cp,HW+2p)

    # ---- constants: column masks, BN folded into weight/bias ----------------
    masks = jnp.asarray(_column_masks(W, HW, dilation), dtype=jnp.bfloat16)

    scale = bn_gamma.astype(jnp.float32) / jnp.sqrt(bn_var.astype(jnp.float32) + eps)
    bias = bn_beta.astype(jnp.float32) - bn_mean.astype(jnp.float32) * scale

    # weight (Cout,Cin,3,3) -> scale-folded (Cout, 9*Cp); K = (ky*3+kx)*Cp + cin
    w_t = jnp.transpose(weight, (0, 2, 3, 1)).astype(jnp.float32)  # (Cout,3,3,Cin)
    w_t = w_t * scale[:, None, None, None]                         # fold BN scale (f32)
    if Cp != Cin:
        w_t = jnp.pad(w_t, ((0, 0), (0, 0), (0, 0), (0, Cp - Cin)))
    w2 = w_t.reshape(Cout, 9 * Cp).astype(jnp.bfloat16)
    if cout_p != Cout:
        w2 = jnp.pad(w2, ((0, cout_p - Cout), (0, 0)))
        bias = jnp.pad(bias, ((0, cout_p - Cout),))
    bias = bias.reshape(cout_p, 1)

    # ---- BlockSpecs ----------------------------------------------------------
    invariant_kwargs = dict(pipeline_mode=pl.Buffered(1)) if _SINGLE_BUFFER_OK else {}
    w_kwargs = invariant_kwargs if n_co == 1 else {}   # w/bias vary with the Cout tile
    x_spec = pl.BlockSpec((None, Cp, HW + 2 * pad), lambda b, j: (b, 0, 0))
    m_spec = pl.BlockSpec((2, HW), lambda b, j: (0, 0), **invariant_kwargs)
    w_spec = pl.BlockSpec((tco, 9 * Cp), lambda b, j: (j, 0), **w_kwargs)
    b_spec = pl.BlockSpec((tco, 1), lambda b, j: (j, 0), **w_kwargs)
    o_spec = pl.BlockSpec((None, tco, HW), lambda b, j: (b, j, 0))

    out_dtype = x_nchw.dtype
    out_isize = jnp.dtype(out_dtype).itemsize

    if use_direct:
        kernel = functools.partial(_convnorm_direct_kernel, img_w=W, dilation=dilation)
        scratch_shapes = []
        col_bytes = 0
        semantics = ("parallel", "parallel")
    else:
        kernel = functools.partial(_convnorm_im2col_kernel, img_w=W, dilation=dilation)
        scratch_shapes = [pltpu.VMEM((9 * Cp, HW), jnp.bfloat16)]
        col_bytes = 9 * Cp * HW * 2
        semantics = ("parallel", "arbitrary")   # im2col scratch reused across Cout tiles

    # VMEM budget from the real per-step footprint (double-buffered operands).
    footprint = (2 * Cp * (HW + 2 * pad) * 2          # x blocks (bf16)
                 + 2 * tco * 9 * Cp * 2               # weight tile (bf16)
                 + 2 * tco * HW * out_isize           # output tile
                 + col_bytes + 2 * 8 * HW * 2 + 2 * tco * 4 + (2 << 20))
    vmem_limit = int(min(100 << 20, max(32 << 20, 2 * footprint)))

    out_flat = pl.pallas_call(
        kernel,
        out_shape=jax.ShapeDtypeStruct((B, cout_p, HW), out_dtype),
        grid_spec=pltpu.PrefetchScalarGridSpec(
            num_scalar_prefetch=0,
            grid=(B, n_co),
            in_specs=[x_spec, m_spec, w_spec, b_spec],
            out_specs=o_spec,
            scratch_shapes=scratch_shapes,
        ),
        compiler_params=pltpu.CompilerParams(
            dimension_semantics=semantics,
            vmem_limit_bytes=vmem_limit),
    )(x_padded, masks, w2, bias)

    if cout_p != Cout:
        out_flat = out_flat[:, :Cout, :]
    return out_flat.reshape(B, Cout, H, W)      # pure reshape (no transpose)


# ----------------------------------------------------------------------------
# Pure-JAX reference (conv -> eval-mode BN -> ReLU).  Operands are rounded to
# bf16 exactly as the kernel's wrapper does, so the comparison validates the
# indexing / fusion logic at tight tolerance (remaining diff = f32 sum order).
# ----------------------------------------------------------------------------
def _reference(x, w, gamma, beta, mean, var, dilation, eps=1e-5):
    scale = gamma / jnp.sqrt(var + eps)
    bias = beta - mean * scale
    xb = x.astype(jnp.bfloat16).astype(jnp.float32)
    wf = (w * scale[:, None, None, None]).astype(jnp.bfloat16).astype(jnp.float32)
    y = jax.lax.conv_general_dilated(
        xb, wf, window_strides=(1, 1),
        padding=((dilation, dilation), (dilation, dilation)),
        rhs_dilation=(dilation, dilation),
        dimension_numbers=("NCHW", "OIHW", "NCHW"),
        precision=jax.lax.Precision.HIGHEST)
    y = y + bias[None, :, None, None]
    return jnp.maximum(y, 0.0)


# ----------------------------------------------------------------------------
if __name__ == "__main__":
    root = jax.random.PRNGKey(0)

    cases = [
        # (B, Cin, Cout, H, W, dilation)
        (2, 4, 8, 16, 16, 1),      # small-Cin im2col path
        (2, 4, 8, 16, 16, 2),      # dilation=2 exercises the column masks
        (1, 128, 16, 16, 16, 1),   # large-Cin scratch-free (direct) path
    ]
    for idx, (B, Cin, Cout, H, W, dil) in enumerate(cases):
        ks = jax.random.split(jax.random.fold_in(root, idx), 6)
        x = jax.random.normal(ks[0], (B, Cin, H, W), jnp.float32)
        weight = 0.1 * jax.random.normal(ks[1], (Cout, Cin, 3, 3), jnp.float32)
        gamma = 1.0 + 0.1 * jax.random.normal(ks[2], (Cout,), jnp.float32)
        beta = 0.1 * jax.random.normal(ks[3], (Cout,), jnp.float32)
        mean = 0.1 * jax.random.normal(ks[4], (Cout,), jnp.float32)
        var = jax.random.uniform(ks[5], (Cout,), jnp.float32,
                                 minval=0.5, maxval=1.5)

        out = conv_norm(x, weight, gamma, beta, mean, var, dilation=dil)
        out = jax.block_until_ready(out)
        assert out.shape == (B, Cout, H, W)

        ref = _reference(x, weight, gamma, beta, mean, var, dil)
        np.testing.assert_allclose(np.asarray(out), np.asarray(ref),
                                   rtol=2e-3, atol=2e-3)

    print("KERNEL_OK")
</pallas_src>

<mosaic_0001>
module attributes {stable_mosaic.version = 11 : i64} {
  func.func @_copy(%arg0: i32, %arg1: memref<8x128xf32, #tpu.memory_space<vmem>>, %arg2: memref<8x128xf32, #tpu.memory_space<vmem>>) attributes {dimension_semantics = [#tpu.dimension_semantics<arbitrary>], iteration_bounds = array<i64: 2>, scalar_prefetch = 0 : i64, scratch_operands = 0 : i64, tpu.core_type = #tpu.core_type<tc>, window_params = [{pipeline_mode = #tpu.pipeline_mode<synchronous>, transform_indices = @transform_0, window_bounds = array<i64: 8, 128>}, {pipeline_mode = #tpu.pipeline_mode<synchronous>, transform_indices = @transform_1, window_bounds = array<i64: 8, 128>}]} {
    %c0 = arith.constant 0 : index
    %c0_0 = arith.constant 0 : index
    %0 = vector.load %arg1[%c0, %c0_0] : memref<8x128xf32, #tpu.memory_space<vmem>>, vector<8x128xf32>
    %c0_1 = arith.constant 0 : index
    %c0_2 = arith.constant 0 : index
    %1 = vector.load %arg2[%c0_1, %c0_2] : memref<8x128xf32, #tpu.memory_space<vmem>>, vector<8x128xf32>
    tpu.vector_store %arg2[%c0_1, %c0_2], %0 {strides = array<i32>} : memref<8x128xf32, #tpu.memory_space<vmem>>, vector<8x128xf32>,
    return
  }
  func.func @transform_0(%arg0: i32) -> (i32, i32) {
    %c0_i32 = arith.constant 0 : i32
    %c0_i32_0 = arith.constant 0 : i32
    %c0_i32_1 = arith.constant 0 : i32
    return %c0_i32, %c0_i32_0 : i32, i32
  }
  func.func @transform_1(%arg0: i32) -> (i32, i32) {
    %c0_i32 = arith.constant 0 : i32
    %c0_i32_0 = arith.constant 0 : i32
    %c0_i32_1 = arith.constant 0 : i32
    return %c0_i32, %c0_i32_0 : i32, i32
  }
}

module attributes {stable_mosaic.version = 11 : i64} {
  func.func @_convnorm_im2col_kernel(%arg0: i32, %arg1: i32, %arg2: memref<1x16x290xbf16, #tpu.memory_space<vmem>>, %arg3: memref<2x256xbf16, #tpu.memory_space<vmem>>, %arg4: memref<8x144xbf16, #tpu.memory_space<vmem>>, %arg5: memref<8x1xf32, #tpu.memory_space<vmem>>, %arg6: memref<1x8x256xf32, #tpu.memory_space<vmem>>, %arg7: memref<144x256xbf16, #tpu.memory_space<vmem>>) attributes {dimension_semantics = [#tpu.dimension_semantics<parallel>, #tpu.dimension_semantics<arbitrary>], iteration_bounds = array<i64: 2, 1>, scalar_prefetch = 0 : i64, scratch_operands = 1 : i64, tpu.core_type = #tpu.core_type<tc>, window_params = [{transform_indices = @transform_0, window_bounds = array<i64: 1, 16, 290>}, {pipeline_mode = #tpu.pipeline_mode<synchronous>, transform_indices = @transform_1, window_bounds = array<i64: 2, 256>}, {transform_indices = @transform_2, window_bounds = array<i64: 8, 144>}, {transform_indices = @transform_3, window_bounds = array<i64: 8, 1>}, {transform_indices = @transform_4, window_bounds = array<i64: 1, 8, 256>}]} {
    %c0_i32 = arith.constant 0 : i32
    %0 = arith.cmpi eq, %arg1, %c0_i32 : i32
    %1 = arith.extui %0 : i1 to i32
    %c0_i32_0 = arith.constant 0 : i32
    %2 = arith.cmpi ne, %1, %c0_i32_0 : i32
    scf.if %2 {
      %c0_10 = arith.constant 0 : index
      %c0_11 = arith.constant 0 : index
      %14 = vector.load %arg3[%c0_10, %c0_11] : memref<2x256xbf16, #tpu.memory_space<vmem>>, vector<1x256xbf16>
      %c1 = arith.constant 1 : index
      %c0_12 = arith.constant 0 : index
      %15 = vector.load %arg3[%c1, %c0_12] : memref<2x256xbf16, #tpu.memory_space<vmem>>, vector<1x256xbf16>
      %c0_13 = arith.constant 0 : index
      %c0_14 = arith.constant 0 : index
      %c0_15 = arith.constant 0 : index
      %16 = vector.load %arg2[%c0_13, %c0_14, %c0_15] : memref<1x16x290xbf16, #tpu.memory_space<vmem>>, vector<1x16x256xbf16>
      %17 = vector.shape_cast %16 : vector<1x16x256xbf16> to vector<16x256xbf16>
      %18 = vector.broadcast %14 : vector<1x256xbf16> to vector<16x256xbf16>
      %19 = arith.mulf %17, %18 : vector<16x256xbf16>
      %c0_16 = arith.constant 0 : index
      %c0_17 = arith.constant 0 : index
      %20 = vector.load %arg7[%c0_16, %c0_17] : memref<144x256xbf16, #tpu.memory_space<vmem>>, vector<16x256xbf16>
      tpu.vector_store %arg7[%c0_16, %c0_17], %19 {strides = array<i32>} : memref<144x256xbf16, #tpu.memory_space<vmem>>, vector<16x256xbf16>,
      %c0_18 = arith.constant 0 : index
      %c0_19 = arith.constant 0 : index
      %c1_20 = arith.constant 1 : index
      %21 = vector.load %arg2[%c0_18, %c0_19, %c1_20] : memref<1x16x290xbf16, #tpu.memory_space<vmem>>, vector<1x16x256xbf16>
      %22 = vector.shape_cast %21 : vector<1x16x256xbf16> to vector<16x256xbf16>
      %c16 = arith.constant 16 : index
      %c0_21 = arith.constant 0 : index
      %23 = vector.load %arg7[%c16, %c0_21] : memref<144x256xbf16, #tpu.memory_space<vmem>>, vector<16x256xbf16>
      tpu.vector_store %arg7[%c16, %c0_21], %22 {strides = array<i32>} : memref<144x256xbf16, #tpu.memory_space<vmem>>, vector<16x256xbf16>,
      %c0_22 = arith.constant 0 : index
      %c0_23 = arith.constant 0 : index
      %c2 = arith.constant 2 : index
      %24 = vector.load %arg2[%c0_22, %c0_23, %c2] : memref<1x16x290xbf16, #tpu.memory_space<vmem>>, vector<1x16x256xbf16>
      %25 = vector.shape_cast %24 : vector<1x16x256xbf16> to vector<16x256xbf16>
      %26 = vector.broadcast %15 : vector<1x256xbf16> to vector<16x256xbf16>
      %27 = arith.mulf %25, %26 : vector<16x256xbf16>
      %c32 = arith.constant 32 : index
      %c0_24 = arith.constant 0 : index
      %28 = vector.load %arg7[%c32, %c0_24] : memref<144x256xbf16, #tpu.memory_space<vmem>>, vector<16x256xbf16>
      tpu.vector_store %arg7[%c32, %c0_24], %27 {strides = array<i32>} : memref<144x256xbf16, #tpu.memory_space<vmem>>, vector<16x256xbf16>,
      %c0_25 = arith.constant 0 : index
      %c0_26 = arith.constant 0 : index
      %c16_27 = arith.constant 16 : index
      %29 = vector.load %arg2[%c0_25, %c0_26, %c16_27] : memref<1x16x290xbf16, #tpu.memory_space<vmem>>, vector<1x16x256xbf16>
      %30 = vector.shape_cast %29 : vector<1x16x256xbf16> to vector<16x256xbf16>
      %31 = vector.broadcast %14 : vector<1x256xbf16> to vector<16x256xbf16>
      %32 = arith.mulf %30, %31 : vector<16x256xbf16>
      %c48 = arith.constant 48 : index
      %c0_28 = arith.constant 0 : index
      %33 = vector.load %arg7[%c48, %c0_28] : memref<144x256xbf16, #tpu.memory_space<vmem>>, vector<16x256xbf16>
      tpu.vector_store %arg7[%c48, %c0_28], %32 {strides = array<i32>} : memref<144x256xbf16, #tpu.memory_space<vmem>>, vector<16x256xbf16>,
      %c0_29 = arith.constant 0 : index
      %c0_30 = arith.constant 0 : index
      %c17 = arith.constant 17 : index
      %34 = vector.load %arg2[%c0_29, %c0_30, %c17] : memref<1x16x290xbf16, #tpu.memory_space<vmem>>, vector<1x16x256xbf16>
      %35 = vector.shape_cast %34 : vector<1x16x256xbf16> to vector<16x256xbf16>
      %c64 = arith.constant 64 : index
      %c0_31 = arith.constant 0 : index
      %36 = vector.load %arg7[%c64, %c0_31] : memref<144x256xbf16, #tpu.memory_space<vmem>>, vector<16x256xbf16>
      tpu.vector_store %arg7[%c64, %c0_31], %35 {strides = array<i32>} : memref<144x256xbf16, #tpu.memory_space<vmem>>, vector<16x256xbf16>,
      %c0_32 = arith.constant 0 : index
      %c0_33 = arith.constant 0 : index
      %c18 = arith.constant 18 : index
      %37 = vector.load %arg2[%c0_32, %c0_33, %c18] : memref<1x16x290xbf16, #tpu.memory_space<vmem>>, vector<1x16x256xbf16>
      %38 = vector.shape_cast %37 : vector<1x16x256xbf16> to vector<16x256xbf16>
      %39 = vector.broadcast %15 : vector<1x256xbf16> to vector<16x256xbf16>
      %40 = arith.mulf %38, %39 : vector<16x256xbf16>
      %c80 = arith.constant 80 : index
      %c0_34 = arith.constant 0 : index
      %41 = vector.load %arg7[%c80, %c0_34] : memref<144x256xbf16, #tpu.memory_space<vmem>>, vector<16x256xbf16>
      tpu.vector_store %arg7[%c80, %c0_34], %40 {strides = array<i32>} : memref<144x256xbf16, #tpu.memory_space<vmem>>, vector<16x256xbf16>,
      %c0_35 = arith.constant 0 : index
      %c0_36 = arith.constant 0 : index
      %c32_37 = arith.constant 32 : index
      %42 = vector.load %arg2[%c0_35, %c0_36, %c32_37] : memref<1x16x290xbf16, #tpu.memory_space<vmem>>, vector<1x16x256xbf16>
      %43 = vector.shape_cast %42 : vector<1x16x256xbf16> to vector<16x256xbf16>
      %44 = vector.broadcast %14 : vector<1x256xbf16> to vector<16x256xbf16>
      %45 = arith.mulf %43, %44 : vector<16x256xbf16>
      %c96 = arith.constant 96 : index
      %c0_38 = arith.constant 0 : index
      %46 = vector.load %arg7[%c96, %c0_38] : memref<144x256xbf16, #tpu.memory_space<vmem>>, vector<16x256xbf16>
      tpu.vector_store %arg7[%c96, %c0_38], %45 {strides = array<i32>} : memref<144x256xbf16, #tpu.memory_space<vmem>>, vector<16x256xbf16>,
      %c0_39 = arith.constant 0 : index
      %c0_40 = arith.constant 0 : index
      %c33 = arith.constant 33 : index
      %47 = vector.load %arg2[%c0_39, %c0_40, %c33] : memref<1x16x290xbf16, #tpu.memory_space<vmem>>, vector<1x16x256xbf16>
      %48 = vector.shape_cast %47 : vector<1x16x256xbf16> to vector<16x256xbf16>
      %c112 = arith.constant 112 : index
      %c0_41 = arith.constant 0 : index
      %49 = vector.load %arg7[%c112, %c0_41] : memref<144x256xbf16, #tpu.memory_space<vmem>>, vector<16x256xbf16>
      tpu.vector_store %arg7[%c112, %c0_41], %48 {strides = array<i32>} : memref<144x256xbf16, #tpu.memory_space<vmem>>, vector<16x256xbf16>,
      %c0_42 = arith.constant 0 : index
      %c0_43 = arith.constant 0 : index
      %c34 = arith.constant 34 : index
      %50 = vector.load %arg2[%c0_42, %c0_43, %c34] : memref<1x16x290xbf16, #tpu.memory_space<vmem>>, vector<1x16x256xbf16>
      %51 = vector.shape_cast %50 : vector<1x16x256xbf16> to vector<16x256xbf16>
      %52 = vector.broadcast %15 : vector<1x256xbf16> to vector<16x256xbf16>
      %53 = arith.mulf %51, %52 : vector<16x256xbf16>
      %c128 = arith.constant 128 : index
      %c0_44 = arith.constant 0 : index
      %54 = vector.load %arg7[%c128, %c0_44] : memref<144x256xbf16, #tpu.memory_space<vmem>>, vector<16x256xbf16>
      tpu.vector_store %arg7[%c128, %c0_44], %53 {strides = array<i32>} : memref<144x256xbf16, #tpu.memory_space<vmem>>, vector<16x256xbf16>,
    } else {
    }
    %c0 = arith.constant 0 : index
    %c0_1 = arith.constant 0 : index
    %3 = vector.load %arg4[%c0, %c0_1] : memref<8x144xbf16, #tpu.memory_space<vmem>>, vector<8x144xbf16>
    %c0_2 = arith.constant 0 : index
    %c0_3 = arith.constant 0 : index
    %4 = vector.load %arg7[%c0_2, %c0_3] : memref<144x256xbf16, #tpu.memory_space<vmem>>, vector<144x256xbf16>
    %cst = arith.constant dense<0.000000e+00> : vector<8x256xf32>
    %5 = tpu.matmul %3, %4, %cst {dimension_numbers = #tpu.dot_dimension_numbers<[1], [0], [0], [1], [0, 0, 1, 1], [], []>} : vector<8x144xbf16>, vector<144x256xbf16>, vector<8x256xf32> -> vector<8x256xf32>
    %c0_4 = arith.constant 0 : index
    %c0_5 = arith.constant 0 : index
    %6 = vector.load %arg5[%c0_4, %c0_5] : memref<8x1xf32, #tpu.memory_space<vmem>>, vector<8x1xf32>
    %7 = vector.broadcast %6 : vector<8x1xf32> to vector<8x256xf32>
    %8 = arith.addf %5, %7 : vector<8x256xf32>
    %cst_6 = arith.constant 0.000000e+00 : f32
    %9 = vector.broadcast %cst_6 : f32 to vector<8x256xf32>
    %10 = arith.maximumf %8, %9 : vector<8x256xf32>
    %c0_7 = arith.constant 0 : index
    %c0_8 = arith.constant 0 : index
    %c0_9 = arith.constant 0 : index
    %11 = vector.load %arg6[%c0_7, %c0_8, %c0_9] : memref<1x8x256xf32, #tpu.memory_space<vmem>>, vector<1x8x256xf32>
    %12 = vector.shape_cast %11 : vector<1x8x256xf32> to vector<8x256xf32>
    %13 = vector.shape_cast %10 : vector<8x256xf32> to vector<1x8x256xf32>
    tpu.vector_store %arg6[%c0_7, %c0_8, %c0_9], %13 {strides = array<i32>} : memref<1x8x256xf32, #tpu.memory_space<vmem>>, vector<1x8x256xf32>,
    return
  }
  func.func @transform_0(%arg0: i32, %arg1: i32) -> (i32, i32, i32) {
    %c0_i32 = arith.constant 0 : i32
    %c0_i32_0 = arith.constant 0 : i32
    %c0_i32_1 = arith.constant 0 : i32
    return %arg0, %c0_i32, %c0_i32_0 : i32, i32, i32
  }
  func.func @transform_1(%arg0: i32, %arg1: i32) -> (i32, i32) {
    %c0_i32 = arith.constant 0 : i32
    %c0_i32_0 = arith.constant 0 : i32
    %c0_i32_1 = arith.constant 0 : i32
    return %c0_i32, %c0_i32_0 : i32, i32
  }
  func.func @transform_2(%arg0: i32, %arg1: i32) -> (i32, i32) {
    %c0_i32 = arith.constant 0 : i32
    %c0_i32_0 = arith.constant 0 : i32
    return %arg1, %c0_i32 : i32, i32
  }
  func.func @transform_3(%arg0: i32, %arg1: i32) -> (i32, i32) {
    %c0_i32 = arith.constant 0 : i32
    %c0_i32_0 = arith.constant 0 : i32
    return %arg1, %c0_i32 : i32, i32
  }
  func.func @transform_4(%arg0: i32, %arg1: i32) -> (i32, i32, i32) {
    %c0_i32 = arith.constant 0 : i32
    %c0_i32_0 = arith.constant 0 : i32
    return %arg0, %arg1, %c0_i32 : i32, i32, i32
  }
}

</mosaic_0001>

<bundles_post_ra>
// kernel: tpu_custom_call.1
= control target key start
LH: loop header
LB: loop body
LE: loop exit
PB: predicated region body
PF: predicated region fallthrough
CT: control target
= control target key end

     0   :  { %6 = vsyncpa [#allocation3], 0  ;;  %s286_s0 = inlined_call_operand.hbm [shape: f32[8,128], index: 0, kind: input, shape index: {}]   ;;  %s287_s1 = inlined_call_operand.hbm [shape: f32[8,128], index: 1, kind: output, shape index: {}]  }
   0x1   :  { %7 = vsyncpa [#allocation4], 0  ;;  %s269_s6 = smov 0  }
   0x2 LB: > { %s148_s7 = sadd.s32 4294967295, %s255_s6   ;;  %p149_p0 = scmp.ge.s32.totalorder %s255_s6, 1  ;;  %s255_s6 = sphi %s269_s6, %s13_s6  }
   0x3   : > { %p60_p1 = scmp.lt.s32.totalorder %s255_s6, 3  ;;  %s72_s10 = sshll.u32 %s286_s0, 4  ;;  %s73_s10 = int_to_ptr.hbm [resolvable:$true] %s72_s10 }
   0x4   : > { %p169_p3 = scmp.eq.s32.totalorder %s148_s7, 0  ;;  %s257_s11 = smov [#allocation2]  }
   0x5   : > { %p61_p2 = pnand %p149_p0, %p60_p1  ;;  %s74_s12 = sshll.u32 %s257_s11, 4  ;;  %s75_s12 = int_to_ptr.vmem [resolvable:$true] %s74_s12 }
   0x7   : > { %p165_p4 = pneg %p61_p2  ;;  %87 = sbr.rel (%p61_p2) target bundleno = 19 (0x13), region = 24 }
   0x9   : > { %p166_p5 = pnand %p169_p3, %p165_p4 }
   0xb   : > { %168 = dma.hbm_to_vmem [thread:$0]  (!%p166_p5), %s73_s10, 128, %s75_s12, [#allocation3]  }
   0xc   : > { %246 = dma.done.wait (%p169_p3), [#allocation3], 128  }
   0xd   : > { %248 = vsyncadd (%p169_p3), [#allocation3], 4294967168  ;;  %s258_s13 = smov [#allocation5]   ;;  %s108_s17 = sshll.u32 %s287_s1, 4  ;;  %v98_v0 = vld [vmem:[#allocation2] sm:$0xff]  ;;  %s109_s17 = int_to_ptr.hbm [resolvable:$true] %s108_s17 }
   0xe   : > { %s106_s14 = sshll.u32 %s258_s13, 4  ;;  %p171_p6 = scmp.eq.s32.totalorder %s148_s7, 1  ;;  %99 = vst [vmem:[#allocation5] sm:$0xff] %v98_v0  ;;  %s107_s14 = int_to_ptr.vmem [resolvable:$true] %s106_s14 }
  0x10   : > { %162 = dma.vmem_to_hbm [thread:$0]  (%p171_p6), %s107_s14, 128, %s109_s17, [#allocation4]  }
  0x11   : > { %250 = dma.done.wait (%p171_p6), [#allocation4], 128  }
  0x12   : > { %252 = vsyncadd (%p171_p6), [#allocation4], 4294967168 }
  0x13 PF: > { %s13_s6 = sadd.s32 1, %s255_s6  }
  0x14   : > { %p10_p7 = scmp.ge.s32.totalorder %s13_s6, 4  }
  0x16   :  { %12 = sbr.rel (!%p10_p7) target bundleno = 2 (0x2), region = 53 }
  0x1b   :  { %122 = vsyncpa [#allocation3], 1 }
  0x1c   :  { %124 = vsyncpa [#allocation3 + $0x1], 1 }
  0x1d   :  { %125 = vsyncpa [#allocation4], 1 }
  0x1e   :  { %127 = vsyncpa [#allocation4 + $0x1], 1 }

// kernel: conv_norm.1
= control target key start
LH: loop header
LB: loop body
LE: loop exit
PB: predicated region body
PF: predicated region fallthrough
CT: control target
= control target key end

     0   :  { %s1193_s15 = smov 0   ;;  %s1195_s16 = smov 0   ;;  %s1358_s0 = inlined_call_operand.vmem [shape: bf16[2,16,290], index: 0, kind: input, shape index: {}]   ;;  %s1359_s1 = inlined_call_operand.vmem [shape: bf16[2,256], index: 1, kind: input, shape index: {}]   ;;  %s1360_s2 = inlined_call_operand.vmem [shape: bf16[8,144], index: 2, kind: input, shape index: {}]   ;;  %s1361_s3 = inlined_call_operand.vmem [shape: f32[8,1], index: 3, kind: input, shape index: {}]   ;;  %s1362_s4 = inlined_call_operand.vmem [shape: f32[2,8,256], index: 4, kind: output, shape index: {}]  }
   0x1   :  { %s1197_s17 = smov 0  }
   0x2 LB: > { %s26_s18 = sadd.s32 1, %s1148_s16  ;;  %p965_p0 = scmp.ge.s32.totalorder %s1152_s17, 1  ;;  %s1152_s17 = sphi %s1197_s17, %s14_s17   ;;  %s1148_s16 = sphi %s1195_s16, %s1364_s16   ;;  %s1144_s15 = sphi %s1193_s15, %s1363_s15  }
   0x3   : > { %p28_p1 = scmp.ge.s32.totalorder %s26_s18, 2  ;;  %p195_p2 = scmp.lt.s32.totalorder %s1152_s17, 3 }
   0x5   : > { %s1366_s18 = smov (%p28_p1, %s26_s18), 0  ;;  %p196_p3 = pnand %p965_p0, %p195_p2 }
   0x6   : > { %p234_p4 = scmp.lt.s32.totalorder (!%p196_p3), %s1144_s15, 1  ;;  %s1154_s25 = smov (!%p196_p3), 95  }
   0x7   : > { %199 = sbr.rel (%p196_p3) target bundleno = 479 (0x1df), region = 36  ;;  %s1155_s26 = smov (!%p196_p3), 16  }
   0x8   : > { %s1156_s27 = smov (!%p196_p3), 32   ;;  %s1157_s28 = smov (!%p196_p3), 111  }
   0x9   : > { %s1158_s29 = smov (!%p196_p3), 2   ;;  %s1159_s30 = smov (!%p196_p3), 34  }
   0xa   : > { %s1160_s5 = smov (!%p196_p3), 18   ;;  %s1161_s6 = smov (!%p196_p3), 127  }
   0xb   : > { %s1162_s7 = smov (!%p196_p3), 96   ;;  %s1163_s8 = smov (!%p196_p3), 112  }
   0xc   : > { %v262_v0 = vld [vmem:[%s1359_s1] sm:$0x3]  ;;  %s1368_s15 = smov (!%p234_p4, %s1144_s15), 1  ;;  %vm309_vm0 = vcmask 1043456   ;;  %vm602_vm1 = vcmask 777216   ;;  %vm541_vm2 = vcmask 261120  }
   0xd   : > { %266 = vst [vmem:[#allocation1] ss:$9 sm:$0xff] %v262_v0  ;;  %s1064_s21 = smul.u32 24, %s1368_s15  ;;  %vm404_vm3 = vcmask 130048   ;;  %vm465_vm4 = vcmask 908288   ;;  %s1164_s9 = smov 110  }
   0xe   : > { %vm487_vm5 = vcmask 146432   ;;  %s1165_s10 = smov 126   ;;  %vm624_vm6 = vcmask 277504   ;;  %vm348_vm7 = vcmask 15360   ;;  %s1166_s11 = smov 94   ;;  %vm311_vm8 = vcmask 1039360  }
   0xf   : > { %s1220_s24 = scalar_lea.vmem %s1358_s0, %s1064_s21  ;;  %vm573_vm9 = vcmask 785408   ;;  %vm436_vm10 = vcmask 916480   ;;  %vm519_vm11 = vcmask 900096   ;;  %vm380_vm12 = vcmask 1031168   ;;  %s1045_s20 = sshll.u32 %s1368_s15, 4 }
  0x10   : > { %v1223_v1 = vld [vmem:[%s1220_s24 + $0xc] sm:$0xff]  ;;  %v582_v2 = vld [vmem:[%s1220_s24 + $0x8] sm:$0xf]  ;;  %v263_v3 = vld [vmem:[%s1220_s24] sm:$0xff]  ;;  %vm656_vm13 = vcmask 769024   ;;  %s256_s23 = scalar_lea.vmem %s1362_s4, %s1045_s20 }
  0x11   : > { %593 = vrot.lane.b32.xlu1 %v1223_v1, %s1154_s25  ;;  %591 = vrot.lane.b32.xlu0 %v582_v2, %s1154_s25  ;;  %v1228_v10 = vunpack.c.l.bf16 %v263_v3  ;;  %v1230_v13 = vunpack.c.h.bf16 %v263_v3  ;;  %v1233_v14 = vunpack.c.l.bf16 %v1223_v1  ;;  %v1236_v15 = vunpack.c.h.bf16 %v1223_v1  ;;  %v584_v16 = vld [vmem:[%s1220_s24 + $0x14] sm:$0xf]  ;;  %v445_v32 = vld [vmem:[%s1220_s24 + $0x8] sm:$0xf] }
  0x12   : > { %589 = vrot.lane.b32.xlu2 %v263_v3, %s1154_s25  ;;  %v447_v36 = vld [vmem:[%s1220_s24 + $0x14] sm:$0xf]  ;;  %v290_v37 = vld [vmem:[%s1220_s24 + $0x8] sm:$0xf] }
  0x13   : > { %v528_v52 = vld [vmem:[%s1220_s24 + $0x8] sm:$0xf]  ;;  %v530_v53 = vld [vmem:[%s1220_s24 + $0x14] sm:$0xf] }
  0x14   : > { %v267_v4 = vld [vmem:[#allocation1] sm:$0xff]  ;;  %v268_v5 = vld [vmem:[#allocation1 + $0x9] sm:$0xff]  ;;  %v533_v55 = vunpack.c.l.bf16 %v528_v52  ;;  %v536_v56 = vunpack.c.l.bf16 %v530_v53  ;;  %v391_v58 = vld [vmem:[%s1220_s24 + $0x14] sm:$0xf] }
  0x15   : > { %v269_v6 = vpack.i.b16 %v267_v4, %v267_v4  ;;  %v272_v7 = vpack.i.b16 %v268_v5, %v268_v5  ;;  %323 = vst [vmem:[#allocation1] ss:$9 sm:$0xff] %v262_v0  ;;  %v389_v57 = vld [vmem:[%s1220_s24 + $0x8] sm:$0xf]  ;;  %v397_v4 = vunpack.c.l.bf16 %v391_v58 }
  0x17   : > { %v271_v8 = vperm.slane %v269_v6, 0  ;;  %v274_v9 = vperm.slane %v272_v7, 0 }
  0x19   : > { %v279_v11 = vunpack.c.l.bf16 %v271_v8  ;;  %v280_v12 = vunpack.c.l.bf16 %v274_v9 }
  0x1a   : > { %595 = vrot.lane.b32.xlu2 %v584_v16, %s1154_s25 }
  0x1b   : > { %v1108_v17 = vpack.i.bf16 %v280_v12, %v279_v11  ;;  %v281_v18 = vmul.f32 %v279_v11, %v1228_v10  ;;  %v282_v19 = vmul.f32 %v280_v12, %v1230_v13  ;;  %v283_v20 = vmul.f32 %v279_v11, %v1233_v14 }
  0x1c   : > { %v284_v21 = vmul.f32 %v280_v12, %v1236_v15  ;;  %v324_v22 = vld [vmem:[#allocation1] sm:$0xff]  ;;  %v325_v23 = vld [vmem:[#allocation1 + $0x9] sm:$0xff] }
  0x1d   : > { %1109 = vrot.lane.b32.xlu1 %v1108_v17, %s1155_s26  ;;  %v285_v24 = vpack.c.bf16 %v282_v19, %v281_v18  ;;  %v326_v25 = vshrl.u32 %v324_v22, 16  ;;  %v330_v26 = vshrl.u32 %v325_v23, 16  ;;  %1104 = vrot.lane.b32.xlu0 %v1108_v17, %s1156_s27 }
  0x1e   : > { %v286_v27 = vpack.c.bf16 %v284_v21, %v283_v20 }
  0x1f   : > { %287 = vst [vmem:[#allocation2] sm:$0xff] %v285_v24  ;;  %v327_v28 = vpack.i.b16 %v326_v25, %v326_v25  ;;  %v331_v29 = vpack.i.b16 %v330_v26, %v330_v26 }
  0x20   : > { %288 = vst [vmem:[#allocation2 + $0x8] sm:$0xff] %v286_v27 }
  0x21   : > { %v329_v30 = vperm.slane %v327_v28, 0  ;;  %v333_v31 = vperm.slane %v331_v29, 0 }
  0x22   : > { %452 = vrot.lane.b32.xlu2 %v263_v3, %s1157_s28 }
  0x23   : > { %v340_v33 = vunpack.c.l.bf16 %v329_v30  ;;  %v341_v34 = vunpack.c.l.bf16 %v333_v31 }
  0x25   : > { %456 = vrot.lane.b32.xlu1 %v1223_v1, %s1157_s28  ;;  %454 = vrot.lane.b32.xlu0 %v445_v32, %s1157_s28  ;;  %v1118_v35 = vpack.i.bf16 %v341_v34, %v340_v33 }
  0x2a   : > { %1124 = vrot.lane.b32.xlu2 %v1118_v35, %s1159_s30 }
  0x2d   : > { %1119 = vrot.lane.b32.xlu1 %v1118_v35, %s1158_s29  ;;  %1114 = vrot.lane.b32.xlu0 %v1118_v35, %s1160_s5 }
  0x32   : > { %458 = vrot.lane.b32.xlu2 %v447_v36, %s1157_s28 }
  0x35   : > { %299 = vrot.lane.b32.xlu0 %v290_v37, %s1161_s6 }
  0x3a   : > { %297 = vrot.lane.b32.xlu2 %v263_v3, %s1161_s6  ;;  %v394_v3 = vunpack.c.l.bf16 %v389_v57 }
  0x6c   : > { %v590_v38 = vpop.permute.xlu2 %589 }
  0x6d   : > { %v597_v41 = vrot.slane %v590_v38, 4 }
  0x74   : > { %v596_v39 = vpop.permute.xlu2 %595 }
  0x75   : > { %v600_v42 = vrot.slane %v596_v39, 4 }
  0x7c   : > { %v1249_v40 = vpop.permute.xlu2 %452 }
  0x7d   : > { %v460_v24 = vrot.slane %v1249_v40, 4 }
  0x83   : > { %v594_v43 = vpop.permute.xlu1 %593  ;;  %v592_v44 = vpop.permute.xlu0 %591 }
  0x84   : > { %v599_v45 = vrot.slane %v594_v43, 4  ;;  %v598_v46 = vrot.slane %v592_v44, 4  ;;  %v1253_v49 = vpop.permute.xlu2 %1124 }
  0x86   : > { %v604_v47 = vsel %vm309_vm0, %v599_v45, %v600_v42  ;;  %v601_v48 = vsel %vm309_vm0, %v597_v41, %v598_v46  ;;  %v476_v41 = vld [vmem:[%s1220_s24 + $0x14] sm:$0xf]  ;;  %v474_v42 = vld [vmem:[%s1220_s24 + $0x8] sm:$0xf] }
  0x87   : > { %v605_v50 = vsel %vm602_vm1, %v594_v43, %v604_v47  ;;  %v603_v51 = vsel %vm602_vm1, %v590_v38, %v601_v48  ;;  %v482_v43 = vunpack.c.l.bf16 %v476_v41  ;;  %v479_v44 = vunpack.c.l.bf16 %v474_v42  ;;  %v322_v47 = vld [vmem:[%s1220_s24 + $0x14] sm:$0xf] }
  0x88   : > { %609 = vst [vmem:[#allocation2 + $0x78] sm:$0xff] %v605_v50 }
  0x89   : > { %608 = vst [vmem:[#allocation2 + $0x70] sm:$0xff] %v603_v51  ;;  %v320_v51 = vld [vmem:[%s1220_s24 + $0x8] sm:$0xf] }
  0x8c   : > { %v459_v11 = vpop.permute.xlu2 %458 }
  0x8d   : > { %v463_v22 = vrot.slane %v459_v11, 4 }
  0x8f   : > { %v1110_v54 = vpop.permute.xlu1 %1109  ;;  %v1105_v59 = vpop.permute.xlu0 %1104  ;;  %v1061_v0 = vld [vmem:[#allocation2 + $0x74] sm:$0xf0]  ;;  %v1029_v2 = vld [vmem:[#allocation2 + $0x78] sm:$0xf0] }
  0x90   : > { %v1112_v60 = vunpack.i.h.bf16 %v1110_v54  ;;  %v1259_v61 = vunpack.i.l.bf16 %v1110_v54  ;;  %v1107_v62 = vunpack.i.h.bf16 %v1105_v59  ;;  %v1106_v63 = vunpack.i.l.bf16 %v1105_v59  ;;  %v1027_v6 = vld [vmem:[#allocation2 + $0x70] sm:$0xf]  ;;  %v1060_v7 = vld [vmem:[#allocation2 + $0x74] sm:$0xf] }
  0x91   : > { %v1028_v16 = vor.u32 %v1061_v0, %v1027_v6  ;;  %v1032_v17 = vor.u32 %v1060_v7, %v1029_v2  ;;  %v1127_v7 = vunpack.i.h.bf16 %v1253_v49 }
  0x92   : > { %v542_v5 = vsel %vm541_vm2, %v1106_v63, %v1107_v62  ;;  %v548_v8 = vmul.f32 %v1107_v62, %v533_v55  ;;  %v551_v9 = vmul.f32 %v1107_v62, %v536_v56  ;;  %v549_v12 = vmul.f32 %v1106_v63, %v1233_v14 }
  0x93   : > { %v550_v18 = vmul.f32 %v542_v5, %v1236_v15  ;;  %v405_v19 = vsel %vm404_vm3, %v1259_v61, %v1112_v60  ;;  %789 = vmatpush.bf16.msra.mxu0 %v1028_v16  ;;  %815 = vmatpush.bf16.msra.mxu2 %v1032_v17  ;;  %v411_v26 = vmul.f32 %v1112_v60, %v394_v3  ;;  %v339_v55 = vunpack.c.l.bf16 %v322_v47 }
  0x94   : > { %v553_v20 = vpack.c.bf16 %v548_v8, %v548_v8  ;;  %v555_v21 = vpack.c.bf16 %v551_v9, %v551_v9  ;;  %v414_v27 = vmul.f32 %v1112_v60, %v397_v4  ;;  %v412_v30 = vmul.f32 %v1259_v61, %v1233_v14 }
  0x95   : > { %v554_v23 = vpack.c.bf16 %v550_v18, %v549_v12  ;;  %v413_v31 = vmul.f32 %v405_v19, %v1236_v15  ;;  %v416_v36 = vpack.c.bf16 %v411_v26, %v411_v26  ;;  %v547_v50 = vmul.f32 %v542_v5, %v1230_v13 }
  0x96   : > { %562 = vrot.lane.b32.xlu1 %v553_v20, %s1162_s7  ;;  %566 = vrot.lane.b32.xlu0 %v555_v21, %s1162_s7  ;;  %v418_v37 = vpack.c.bf16 %v414_v27, %v414_v27  ;;  %v336_v56 = vunpack.c.l.bf16 %v320_v51  ;;  %v410_v0 = vmul.f32 %v405_v19, %v1230_v13  ;;  %v1126_v8 = vunpack.i.l.bf16 %v1253_v49  ;;  %v292_v20 = vld [vmem:[%s1220_s24 + $0x14] sm:$0xf] }
  0x97   : > { %v457_v25 = vpop.permute.xlu1 %456  ;;  %v455_v29 = vpop.permute.xlu0 %454  ;;  %564 = vrot.lane.b32.xlu2 %v554_v23, %s1162_s7  ;;  %v417_v39 = vpack.c.bf16 %v413_v31, %v412_v30  ;;  %v613_v31 = vld [vmem:[%s1220_s24 + $0x14] sm:$0xf] }
  0x98   : > { %v462_v28 = vrot.slane %v457_v25, 4  ;;  %v461_v32 = vrot.slane %v455_v29, 4  ;;  %v625_v17 = vsel %vm624_vm6, %v1126_v8, %v1127_v7  ;;  %v632_v49 = vmul.f32 %v1126_v8, %v1233_v14 }
  0x99   : > { %v629_v27 = vmul.f32 %v1126_v8, %v1228_v10 }
  0x9a   : > { %v467_v33 = vsel %vm309_vm0, %v462_v28, %v463_v22  ;;  %v464_v34 = vsel %vm309_vm0, %v460_v24, %v461_v32  ;;  %v633_v22 = vmul.f32 %v625_v17, %v1236_v15  ;;  %v630_v28 = vmul.f32 %v625_v17, %v1230_v13 }
  0x9b   : > { %v468_v35 = vsel %vm465_vm4, %v457_v25, %v467_v33  ;;  %v466_v38 = vsel %vm465_vm4, %v1249_v40, %v464_v34  ;;  %v546_v40 = vmul.f32 %v1106_v63, %v1228_v10  ;;  %v409_v63 = vmul.f32 %v1259_v61, %v1228_v10 }
  0x9c   : > { %472 = vst [vmem:[#allocation2 + $0x48] sm:$0xff] %v468_v35  ;;  %v637_v25 = vpack.c.bf16 %v633_v22, %v632_v49  ;;  %v619_v34 = vunpack.c.l.bf16 %v613_v31 }
  0x9d   : > { %471 = vst [vmem:[#allocation2 + $0x40] sm:$0xff] %v466_v38  ;;  %v552_v58 = vpack.c.bf16 %v547_v50, %v546_v40  ;;  %v415_v5 = vpack.c.bf16 %v410_v0, %v409_v63 }
  0x9e   : > { %425 = vrot.lane.b32.xlu1 %v416_v36, %s1163_s8  ;;  %429 = vrot.lane.b32.xlu0 %v418_v37, %s1163_s8  ;;  %v634_v35 = vmul.f32 %v1127_v7, %v619_v34  ;;  %v683_v34 = vld [vmem:[%s1361_s3] sm:$0xff] }
  0x9f   : > { %v1115_v45 = vpop.permute.xlu0 %1114  ;;  %427 = vrot.lane.b32.xlu2 %v417_v39, %s1163_s8  ;;  %v1120_v46 = vpop.permute.xlu1 %1119 }
  0xa0   : > { %v1117_v48 = vunpack.i.h.bf16 %v1115_v45  ;;  %v1122_v52 = vunpack.i.h.bf16 %v1120_v46  ;;  %v1116_v2 = vunpack.i.l.bf16 %v1115_v45  ;;  %v1121_v16 = vunpack.i.l.bf16 %v1120_v46  ;;  %v298_v39 = vpop.permute.xlu2 %297 }
  0xa1   : > { %v638_v37 = vpack.c.bf16 %v634_v35, %v634_v35 }
  0xa2   : > { %v497_v53 = vmul.f32 %v1117_v48, %v482_v43  ;;  %v494_v54 = vmul.f32 %v1117_v48, %v479_v44  ;;  %v358_v60 = vmul.f32 %v1122_v52, %v339_v55  ;;  %v355_v62 = vmul.f32 %v1122_v52, %v336_v56 }
  0xa3   : > { %v488_v6 = vsel %vm487_vm5, %v1116_v2, %v1117_v48  ;;  %v492_v61 = vmul.f32 %v1116_v2, %v1228_v10  ;;  %v495_v11 = vmul.f32 %v1116_v2, %v1233_v14  ;;  %v349_v21 = vsel %vm348_vm7, %v1121_v16, %v1122_v52 }
  0xa4   : > { %v501_v57 = vpack.c.bf16 %v497_v53, %v497_v53  ;;  %v499_v59 = vpack.c.bf16 %v494_v54, %v494_v54  ;;  %v362_v3 = vpack.c.bf16 %v358_v60, %v358_v60  ;;  %v360_v4 = vpack.c.bf16 %v355_v62, %v355_v62 }
  0xa5   : > { %v493_v9 = vmul.f32 %v488_v6, %v1230_v13  ;;  %v496_v12 = vmul.f32 %v488_v6, %v1236_v15  ;;  %v356_v23 = vmul.f32 %v1121_v16, %v1233_v14  ;;  %v357_v24 = vmul.f32 %v349_v21, %v1236_v15  ;;  %v611_v14 = vld [vmem:[%s1220_s24 + $0x8] sm:$0xf] }
  0xa6   : > { %512 = vrot.lane.b32.xlu1 %v501_v57, %s1164_s9  ;;  %560 = vrot.lane.b32.xlu0 %v552_v58, %s1162_s7  ;;  %v353_v29 = vmul.f32 %v1121_v16, %v1228_v10  ;;  %v354_v30 = vmul.f32 %v349_v21, %v1230_v13  ;;  %v635_v15 = vpack.c.bf16 %v630_v28, %v629_v27  ;;  %v616_v33 = vunpack.c.l.bf16 %v611_v14 }
  0xa7   : > { %508 = vrot.lane.b32.xlu2 %v499_v59, %s1164_s9  ;;  %v498_v18 = vpack.c.bf16 %v493_v9, %v492_v61  ;;  %v500_v19 = vpack.c.bf16 %v496_v12, %v495_v11  ;;  %v361_v26 = vpack.c.bf16 %v357_v24, %v356_v23  ;;  %v300_v38 = vpop.permute.xlu0 %299  ;;  %v305_v10 = vrot.slane %v298_v39, 4 }
  0xa8   : > { %v359_v32 = vpack.c.bf16 %v354_v30, %v353_v29  ;;  %v306_v41 = vrot.slane %v300_v38, 4 }
  0xaa   : > { %v310_v13 = vsel %vm309_vm0, %v305_v10, %v306_v41  ;;  %v1167_v10 = vmov 0  }
  0xab   : > { %v312_v42 = vsel %vm311_vm8, %v298_v39, %v310_v13  ;;  %1128 = vset.pattern.permute.xlu1 %v1167_v10  ;;  %1129 = vset.pattern.permute.xlu0 %v1167_v10 }
  0xac   : > { %317 = vst [vmem:[#allocation2 + $0x10] sm:$0xff] %v312_v42  ;;  %v1055_v42 = vld [vmem:[#allocation2 + $0x44] sm:$0xf0] }
  0xae   : > { %373 = vrot.lane.b32.xlu1 %v362_v3, %s1165_s10  ;;  %423 = vrot.lane.b32.xlu0 %v415_v5, %s1163_s8 }
  0xaf   : > { %369 = vrot.lane.b32.xlu2 %v360_v4, %s1165_s10 }
  0xb6   : > { %506 = vrot.lane.b32.xlu1 %v498_v18, %s1164_s9  ;;  %510 = vrot.lane.b32.xlu0 %v500_v19, %s1164_s9 }
  0xb7   : > { %303 = vrot.lane.b32.xlu2 %v292_v20, %s1161_s6 }
  0xbe   : > { %301 = vrot.lane.b32.xlu1 %v1223_v1, %s1161_s6  ;;  %371 = vrot.lane.b32.xlu0 %v361_v26, %s1165_s10  ;;  %v631_v1 = vmul.f32 %v1127_v7, %v616_v33 }
  0xbf   : > { %647 = vrot.lane.b32.xlu2 %v637_v25, %s1166_s11 }
  0xc0   : > { %v636_v36 = vpack.c.bf16 %v631_v1, %v631_v1 }
  0xc6   : > { %367 = vrot.lane.b32.xlu1 %v359_v32, %s1165_s10  ;;  %643 = vrot.lane.b32.xlu0 %v635_v15, %s1166_s11 }
  0xce   : > { %645 = vrot.lane.b32.xlu1 %v636_v36, %s1166_s11  ;;  %649 = vrot.lane.b32.xlu0 %v638_v37, %s1166_s11 }
  0xd6   : > { %686 = vperm.xlu1 %1128, %v683_v34  }
  0xf1   : > { %v565_v43 = vpop.permute.xlu2 %564 }
  0xf2   : > { %v570_v46 = vrot.slane %v565_v43, 4 }
  0xf9   : > { %v428_v50 = vpop.permute.xlu2 %427 }
  0xfa   : > { %v433_v53 = vrot.slane %v428_v50, 4 }
 0x101   : > { %v509_v63 = vpop.permute.xlu2 %508 }
 0x102   : > { %v515_v18 = vrot.slane %v509_v63, 4 }
 0x108   : > { %v563_v44 = vpop.permute.xlu1 %562  ;;  %v567_v45 = vpop.permute.xlu0 %566 }
 0x109   : > { %v571_v47 = vrot.slane %v567_v45, 4  ;;  %v569_v59 = vrot.slane %v563_v44, 4  ;;  %v370_v17 = vpop.permute.xlu2 %369  ;;  %v1054_v44 = vld [vmem:[#allocation2 + $0x44] sm:$0xf]  ;;  %v1005_v45 = vld [vmem:[#allocation2 + $0x48] sm:$0xf0] }
 0x10b   : > { %v575_v48 = vsel %vm309_vm0, %v570_v46, %v571_v47 }
 0x10c   : > { %v576_v40 = vsel %vm573_vm9, %v565_v43, %v575_v48  ;;  %v1003_v43 = vld [vmem:[#allocation2 + $0x40] sm:$0xf]  ;;  %v376_v48 = vrot.slane %v370_v17, 4 }
 0x10d   : > { %580 = vst [vmem:[#allocation2 + $0x68] sm:$0xff] %v576_v40 }
 0x110   : > { %v426_v51 = vpop.permute.xlu1 %425  ;;  %v430_v52 = vpop.permute.xlu0 %429 }
 0x111   : > { %v434_v54 = vrot.slane %v430_v52, 4  ;;  %v432_v4 = vrot.slane %v426_v51, 4  ;;  %v304_v27 = vpop.permute.xlu2 %303  ;;  %v1008_v51 = vor.u32 %v1054_v44, %v1005_v45 }
 0x112   : > { %v308_v28 = vrot.slane %v304_v27, 4 }
 0x113   : > { %v438_v55 = vsel %vm309_vm0, %v433_v53, %v434_v54 }
 0x114   : > { %v439_v56 = vsel %vm436_vm10, %v428_v50, %v438_v55  ;;  %v1059_v7 = vld [vmem:[#allocation2 + $0x64] sm:$0xf0]  ;;  %v1021_v11 = vld [vmem:[#allocation2 + $0x68] sm:$0xf0]  ;;  %v1004_v50 = vor.u32 %v1055_v42, %v1003_v43 }
 0x115   : > { %443 = vst [vmem:[#allocation2 + $0x38] sm:$0xff] %v439_v56 }
 0x118   : > { %v513_v57 = vpop.permute.xlu1 %512  ;;  %v561_v58 = vpop.permute.xlu0 %560 }
 0x119   : > { %v568_v60 = vrot.slane %v561_v58, 4  ;;  %v517_v21 = vrot.slane %v513_v57, 4  ;;  %v648_v56 = vpop.permute.xlu2 %647 }
 0x11b   : > { %v572_v62 = vsel %vm309_vm0, %v568_v60, %v569_v59 }
 0x11c   : > { %v574_v0 = vsel %vm573_vm9, %v561_v58, %v572_v62  ;;  %v1053_v57 = vld [vmem:[#allocation2 + $0x34] sm:$0xf0]  ;;  %v997_v58 = vld [vmem:[#allocation2 + $0x38] sm:$0xf0]  ;;  %v653_v62 = vrot.slane %v648_v56, 4 }
 0x11d   : > { %579 = vst [vmem:[#allocation2 + $0x60] sm:$0xff] %v574_v0 }
 0x120   : > { %v374_v2 = vpop.permute.xlu1 %373  ;;  %v424_v3 = vpop.permute.xlu0 %423 }
 0x121   : > { %v431_v5 = vrot.slane %v424_v3, 4  ;;  %v378_v14 = vrot.slane %v374_v2, 4 }
 0x123   : > { %v435_v6 = vsel %vm309_vm0, %v431_v5, %v432_v4 }
 0x124   : > { %v437_v8 = vsel %vm436_vm10, %v424_v3, %v435_v6  ;;  %v1019_v61 = vld [vmem:[#allocation2 + $0x60] sm:$0xf]  ;;  %v1058_v9 = vld [vmem:[#allocation2 + $0x64] sm:$0xf] }
 0x125   : > { %442 = vst [vmem:[#allocation2 + $0x30] sm:$0xff] %v437_v8  ;;  %v1020_v12 = vor.u32 %v1059_v7, %v1019_v61  ;;  %v1024_v16 = vor.u32 %v1058_v9, %v1021_v11 }
 0x127   : > { %790 = vmatpush.bf16.msra.mxu0 %v1020_v12  ;;  %816 = vmatpush.bf16.msra.mxu2 %v1024_v16 }
 0x128   : > { %v507_v19 = vpop.permute.xlu1 %506  ;;  %v511_v20 = vpop.permute.xlu0 %510 }
 0x129   : > { %v514_v49 = vrot.slane %v507_v19, 4  ;;  %v516_v22 = vrot.slane %v511_v20, 4 }
 0x12b   : > { %v518_v23 = vsel %vm309_vm0, %v514_v49, %v515_v18  ;;  %v521_v24 = vsel %vm309_vm0, %v516_v22, %v517_v21  ;;  %v979_v18 = vld [vmem:[#allocation2 + $0x10] sm:$0xf]  ;;  %v1048_v21 = vld [vmem:[#allocation2 + $0x14] sm:$0xf]  ;;  %v971_v49 = vld [vmem:[#allocation2] sm:$0xf] }
 0x12c   : > { %v520_v25 = vsel %vm519_vm11, %v507_v19, %v518_v23  ;;  %v522_v26 = vsel %vm519_vm11, %v511_v20, %v521_v24  ;;  %v995_v53 = vld [vmem:[#allocation2 + $0x30] sm:$0xf]  ;;  %v1052_v54 = vld [vmem:[#allocation2 + $0x34] sm:$0xf]  ;;  %v664_v22 = vld [vmem:[%s1360_s2] sm:$0xff] }
 0x12d   : > { %525 = vst [vmem:[#allocation2 + $0x50] sm:$0xff] %v520_v25  ;;  %v996_v59 = vor.u32 %v1053_v57, %v995_v53  ;;  %v1000_v60 = vor.u32 %v1052_v54, %v997_v58  ;;  %v1047_v23 = vld [vmem:[#allocation2 + $0x4] sm:$0xf0]  ;;  %v1046_v24 = vld [vmem:[#allocation2 + $0x4] sm:$0xf] }
 0x12e   : > { %526 = vst [vmem:[#allocation2 + $0x58] sm:$0xff] %v522_v26  ;;  %v973_v25 = vld [vmem:[#allocation2 + $0x8] sm:$0xf0] }
 0x130   : > { %v302_v29 = vpop.permute.xlu1 %301  ;;  %v372_v30 = vpop.permute.xlu0 %371 }
 0x131   : > { %v307_v31 = vrot.slane %v302_v29, 4  ;;  %v377_v15 = vrot.slane %v372_v30, 4 }
 0x133   : > { %v313_v32 = vsel %vm309_vm0, %v307_v31, %v308_v28  ;;  %v382_v33 = vsel %vm309_vm0, %v377_v15, %v378_v14  ;;  %v690_v28 = vunpack.c.l.b16 %v664_v22  ;;  %v691_v14 = vunpack.c.h.b16 %v664_v22 }
 0x134   : > { %v314_v1 = vsel %vm311_vm8, %v302_v29, %v313_v32  ;;  %v383_v35 = vsel %vm380_vm12, %v372_v30, %v382_v33  ;;  %v1011_v36 = vld [vmem:[#allocation2 + $0x50] sm:$0xf]  ;;  %v1056_v37 = vld [vmem:[#allocation2 + $0x54] sm:$0xf]  ;;  %v972_v29 = vor.u32 %v1047_v23, %v971_v49  ;;  %v976_v30 = vor.u32 %v1046_v24, %v973_v25 }
 0x135   : > { %318 = vst [vmem:[#allocation2 + $0x18] sm:$0xff] %v314_v1  ;;  %v1057_v38 = vld [vmem:[#allocation2 + $0x54] sm:$0xf0]  ;;  %v1013_v39 = vld [vmem:[#allocation2 + $0x58] sm:$0xf0] }
 0x136   : > { %387 = vst [vmem:[#allocation2 + $0x28] sm:$0xff] %v383_v35  ;;  %v1012_v41 = vor.u32 %v1057_v38, %v1011_v36  ;;  %v1016_v13 = vor.u32 %v1056_v37, %v1013_v39  ;;  %v692_v35 = vpack.c.b16 %v690_v28, %v690_v28  ;;  %v693_v36 = vpack.c.b16 %v691_v14, %v691_v14 }
 0x138   : > { %791 = vmatpush.bf16.msra.mxu0 %v1012_v41  ;;  %817 = vmatpush.bf16.msra.mxu2 %v1016_v13  ;;  %v368_v46 = vpop.permute.xlu1 %367  ;;  %v644_v47 = vpop.permute.xlu0 %643 }
 0x139   : > { %v375_v40 = vrot.slane %v368_v46, 4  ;;  %v651_v2 = vrot.slane %v644_v47, 4 }
 0x13b   : > { %v379_v52 = vsel %vm309_vm0, %v375_v40, %v376_v48 }
 0x13c   : > { %v381_v55 = vsel %vm380_vm12, %v368_v46, %v379_v52  ;;  %792 = vmatpush.bf16.msra.mxu0 %v1004_v50  ;;  %818 = vmatpush.bf16.msra.mxu2 %v1008_v51  ;;  %v1049_v19 = vld [vmem:[#allocation2 + $0x14] sm:$0xf0]  ;;  %v981_v20 = vld [vmem:[#allocation2 + $0x18] sm:$0xf0] }
 0x13d   : > { %386 = vst [vmem:[#allocation2 + $0x20] sm:$0xff] %v381_v55  ;;  %v1051_v7 = vld [vmem:[#allocation2 + $0x24] sm:$0xf0]  ;;  %v989_v12 = vld [vmem:[#allocation2 + $0x28] sm:$0xf0]  ;;  %v980_v26 = vor.u32 %v1049_v19, %v979_v18  ;;  %v984_v27 = vor.u32 %v1048_v21, %v981_v20 }
 0x140   : > { %793 = vmatpush.bf16.msra.mxu0 %v996_v59  ;;  %819 = vmatpush.bf16.msra.mxu2 %v1000_v60  ;;  %v646_v63 = vpop.permute.xlu1 %645  ;;  %v650_v0 = vpop.permute.xlu0 %649 }
 0x141   : > { %v652_v3 = vrot.slane %v646_v63, 4  ;;  %v654_v4 = vrot.slane %v650_v0, 4 }
 0x143   : > { %v655_v5 = vsel %vm309_vm0, %v651_v2, %v652_v3  ;;  %v658_v6 = vsel %vm309_vm0, %v653_v62, %v654_v4 }
 0x144   : > { %v657_v8 = vsel %vm656_vm13, %v644_v47, %v655_v5  ;;  %v659_v61 = vsel %vm656_vm13, %v648_v56, %v658_v6  ;;  %v987_v9 = vld [vmem:[#allocation2 + $0x20] sm:$0xf]  ;;  %v1050_v11 = vld [vmem:[#allocation2 + $0x24] sm:$0xf] }
 0x145   : > { %662 = vst [vmem:[#allocation2 + $0x80] sm:$0xff] %v657_v8  ;;  %v988_v16 = vor.u32 %v1051_v7, %v987_v9  ;;  %v992_v17 = vor.u32 %v1050_v11, %v989_v12 }
 0x146   : > { %663 = vst [vmem:[#allocation2 + $0x88] sm:$0xff] %v659_v61 }
 0x147   : > { %794 = vmatpush.bf16.msra.mxu0 %v988_v16  ;;  %820 = vmatpush.bf16.msra.mxu2 %v992_v17 }
 0x148   : > { %v687_v37 = vpop.permute.xlu1 %686 }
 0x14b   : > { %795 = vmatpush.bf16.msra.mxu0 %v980_v26  ;;  %821 = vmatpush.bf16.msra.mxu2 %v984_v27 }
 0x14c   : > { %v1035_v31 = vld [vmem:[#allocation2 + $0x80] sm:$0xf]  ;;  %v1062_v15 = vld [vmem:[#allocation2 + $0x84] sm:$0xf] }
 0x14d   : > { %v1063_v32 = vld [vmem:[#allocation2 + $0x84] sm:$0xf0]  ;;  %v1037_v33 = vld [vmem:[#allocation2 + $0x88] sm:$0xf0] }
 0x14e   : > { %v1036_v34 = vor.u32 %v1063_v32, %v1035_v31  ;;  %v1040_v1 = vor.u32 %v1062_v15, %v1037_v33 }
 0x14f   : > { %796 = vmatpush.bf16.msra.mxu0 %v972_v29  ;;  %822 = vmatpush.bf16.msra.mxu2 %v976_v30 }
 0x150   : > { %809 = vmatpush.bf16.msra.mxu1 %v1036_v34  ;;  %835 = vmatpush.bf16.msra.mxu3 %v1040_v1 }
 0x152   : > { %797 = vmatmul.bf16.vlgmr.msra.gmra.mxu0 %v692_v35  ;;  %823 = vmatmul.bf16.vlgmr.msra.gmra.mxu2 %v692_v35 }
 0x153   : > { %1041 = vmatmul.msk.bf16.vlgmr.msra.gmra.mxu1 %vm404_vm3, %v693_v36  ;;  %1042 = vmatmul.msk.bf16.vlgmr.msra.gmra.mxu3 %vm404_vm3, %v693_v36 }
 0x1cf   : > { %v798_v38 = vpop.f32.mrf.mxu0 }
 0x1d0   : > { %v811_v39 = vpop.f32.mrf.mxu1  ;;  %v799_v10 = vadd.f32 %v798_v38, %v687_v37 }
 0x1d2   : > { %v812_v41 = vadd.f32 %v811_v39, %v799_v10 }
 0x1d4   : > { %v841_v13 = vmax.f32 %v812_v41, 0.0 }
 0x1d5   : > { %v824_v42 = vpop.f32.mrf.mxu2 }
 0x1d6   : > { %v825_v43 = vadd.f32 %v824_v42, %v687_v37  ;;  %v837_v44 = vpop.f32.mrf.mxu3  ;;  %843 = vst [vmem:[%s256_s23] sm:$0xff] %v841_v13 }
 0x1d7   : > { %v800_v45 = vpop.f32.mrf.mxu0 }
 0x1d8   : > { %v838_v46 = vadd.f32 %v837_v44, %v825_v43  ;;  %v813_v47 = vpop.f32.mrf.mxu1 }
 0x1da   : > { %v842_v48 = vmax.f32 %v838_v46, 0.0 }
 0x1dc   : > { %844 = vst [vmem:[%s256_s23 + $0x8] sm:$0xff] %v842_v48 }
 0x1dd   : > { %v826_v40 = vpop.f32.mrf.mxu2 }
 0x1de   : > { %v839_v50 = vpop.f32.mrf.mxu3 }
 0x1df PF: > { %s14_s17 = sadd.s32 1, %s1152_s17   ;;  %s1363_s15 = smov %s1148_s16 }
 0x1e0   : > { %p11_p5 = scmp.ge.s32.totalorder %s14_s17, 4   ;;  %s1364_s16 = smov %s1366_s18 }
 0x1e2   :  { %13 = sbr.rel (!%p11_p5) target bundleno = 2 (0x2), region = 76 }

</bundles_post_ra>
